<compile_context>
chip_gen: v6e
topology: v6e:2x2x1
jax: 0.10.0
libtpu: 0.0.40
codegen_flags: <defaults>
</compile_context>

<pallas_src>
import functools

import jax
import jax.numpy as jnp
from jax.experimental import pallas as pl
from jax.experimental.pallas import tpu as pltpu

EPS = 1e-6
DIMS = (96, 192, 384, 768)
DEPTHS = (1, 1, 1, 1)

VMEM_SMALL = pltpu.CompilerParams(vmem_limit_bytes=32 * 1024 * 1024)


# ----------------------------------------------------------------------------
# Kernels
# ----------------------------------------------------------------------------
def _matmul_kernel(a_ref, b_ref, o_ref):
    # plain f32 matmul (used by the bilinear resize)
    o_ref[...] = jnp.dot(a_ref[...], b_ref[...], preferred_element_type=jnp.float32)


def _linear_kernel(x_ref, w_ref, b_ref, o_ref):
    # x: (N, K) f32   w: (K, M) bf16   b: (1, M) f32   o: (N, M) f32
    x = x_ref[...].astype(jnp.bfloat16)
    o_ref[...] = (
        jnp.dot(x, w_ref[...], preferred_element_type=jnp.float32) + b_ref[...]
    )


def _linear_ln_kernel(x_ref, w_ref, b_ref, g_ref, bb_ref, o_ref):
    # fused Linear (bf16 MXU) + LayerNorm over the output channel dim
    x = x_ref[...].astype(jnp.bfloat16)
    y = jnp.dot(x, w_ref[...], preferred_element_type=jnp.float32) + b_ref[...]
    mu = jnp.mean(y, axis=-1, keepdims=True)
    yc = y - mu
    var = jnp.mean(yc * yc, axis=-1, keepdims=True)
    o_ref[...] = yc * jax.lax.rsqrt(var + EPS) * g_ref[...] + bb_ref[...]


def _layernorm_kernel(x_ref, g_ref, b_ref, o_ref):
    # x: (N, C)  g,b: (1, C) — LayerNorm over last dim, eps=1e-6 (f32 math)
    x = x_ref[...]
    mu = jnp.mean(x, axis=-1, keepdims=True)
    xc = x - mu
    var = jnp.mean(xc * xc, axis=-1, keepdims=True)
    o_ref[...] = xc * jax.lax.rsqrt(var + EPS) * g_ref[...] + b_ref[...]


def _pool_ln_head_kernel(x_ref, p_ref, g_ref, b_ref, hw_ref, hb_ref, o_ref):
    # fused: global average pool (as a tiny matmul) + LayerNorm + head Linear
    # x: (B*HW, C)  p: (B, B*HW) averaging matrix  hw: (C, 6)  o: (B, 6)
    f = jnp.dot(p_ref[...], x_ref[...], preferred_element_type=jnp.float32)  # (B, C)
    mu = jnp.mean(f, axis=-1, keepdims=True)
    fc = f - mu
    var = jnp.mean(fc * fc, axis=-1, keepdims=True)
    fn = fc * jax.lax.rsqrt(var + EPS) * g_ref[...] + b_ref[...]
    o_ref[...] = (
        jnp.dot(fn, hw_ref[...], preferred_element_type=jnp.float32) + hb_ref[...]
    )


def _convnext_block_kernel(xpad_ref, dww_ref, dwb_ref, lng_ref, lnb_ref,
                           w1_ref, b1_ref, w2_ref, b2_ref, ls_ref, o_ref,
                           *, H, W, C):
    # xpad: (1, H+6, W+6, C) f32   dww: (49, C) f32   w1/w2: bf16   everything else f32
    # depthwise 7x7 (padding=3): iterate the 7 ky row offsets (cheap slices along H,
    # neither lane nor sublane axis), reuse each row band for the 7 kx offsets, and
    # hoist the (49, C) weight load out of the loop.
    dww = dww_ref[...]                                      # (49, C), loaded once
    y = jnp.zeros((H, W, C), jnp.float32)
    for ky in range(7):
        band = xpad_ref[0, ky:ky + H, :, :]                 # (H, W+6, C)
        for kx in range(7):
            k = ky * 7 + kx
            y = y + band[:, kx:kx + W, :] * dww[k:k + 1, :]
    y = y + dwb_ref[...]

    # LayerNorm over channels (f32)
    yf = y.reshape(H * W, C)
    mu = jnp.mean(yf, axis=-1, keepdims=True)
    yc = yf - mu
    var = jnp.mean(yc * yc, axis=-1, keepdims=True)
    yn = yc * jax.lax.rsqrt(var + EPS) * lng_ref[...] + lnb_ref[...]

    # pointwise MLP: C -> 4C -> C; bf16 operands on the MXU, f32 accumulation,
    # exact (erf) GELU to match nn.GELU numerics.
    h = jnp.dot(yn.astype(jnp.bfloat16), w1_ref[...],
                preferred_element_type=jnp.float32) + b1_ref[...]
    h = jax.nn.gelu(h, approximate=False)
    z = jnp.dot(h.astype(jnp.bfloat16), w2_ref[...],
                preferred_element_type=jnp.float32) + b2_ref[...]

    # layer scale + residual
    z = z * ls_ref[...]
    x_res = xpad_ref[0, 3:3 + H, 3:3 + W, :]                # residual input (H, W, C)
    o_ref[0] = x_res + z.reshape(H, W, C)


# ----------------------------------------------------------------------------
# Pallas-call wrappers
# ----------------------------------------------------------------------------
def _matmul(a, b):
    N, K = a.shape
    M = b.shape[1]
    return pl.pallas_call(
        _matmul_kernel,
        out_shape=jax.ShapeDtypeStruct((N, M), jnp.float32),
        grid=(1,),
        in_specs=[pl.BlockSpec((N, K), lambda i: (0, 0)),
                  pl.BlockSpec((K, M), lambda i: (0, 0))],
        out_specs=pl.BlockSpec((N, M), lambda i: (0, 0)),
        compiler_params=VMEM_SMALL,
    )(a.astype(jnp.float32), b.astype(jnp.float32))


def _interp_matrix(out_size, in_size):
    # bilinear, align_corners=True: src = i * (in-1) / (out-1)
    if in_size == 1:
        return jnp.ones((out_size, 1), jnp.float32)
    src = jnp.arange(out_size, dtype=jnp.float32) * (in_size - 1) / (out_size - 1)
    i0 = jnp.clip(jnp.floor(src).astype(jnp.int32), 0, in_size - 2)
    frac = src - i0.astype(jnp.float32)
    m = jnp.zeros((out_size, in_size), jnp.float32)
    rows = jnp.arange(out_size)
    m = m.at[rows, i0].add(1.0 - frac)
    m = m.at[rows, i0 + 1].add(frac)
    return m


def bilinear_resize_224_nhwc(x):
    # x: (B, C, H, W) NCHW -> (B, 224, 224, C) NHWC, bilinear align_corners=True.
    # Both interpolation passes are batched over all B*C planes as single flat
    # matmuls; the W-direction matrix is pre-transposed on the host (no in-kernel
    # transpose, no per-plane grid steps).
    B, C, H, W = x.shape
    OH = OW = 224
    wh = _interp_matrix(OH, H)                       # (OH, H)
    wwT = _interp_matrix(OW, W).T                    # (W, OW)
    xf = x.astype(jnp.float32).reshape(B * C * H, W)
    tmp = _matmul(xf, wwT)                           # (B*C*H, OW)
    tmp = tmp.reshape(B, C, H, OW).transpose(2, 0, 1, 3).reshape(H, B * C * OW)
    out = _matmul(wh, tmp)                           # (OH, B*C*OW)
    return out.reshape(OH, B, C, OW).transpose(1, 0, 3, 2)   # (B, OH, OW, C)


def linear(x, w_bf16, b):
    N, K = x.shape
    M = w_bf16.shape[1]
    return pl.pallas_call(
        _linear_kernel,
        out_shape=jax.ShapeDtypeStruct((N, M), jnp.float32),
        grid=(1,),
        in_specs=[pl.BlockSpec((N, K), lambda i: (0, 0)),
                  pl.BlockSpec((K, M), lambda i: (0, 0)),
                  pl.BlockSpec((1, M), lambda i: (0, 0))],
        out_specs=pl.BlockSpec((N, M), lambda i: (0, 0)),
        compiler_params=VMEM_SMALL,
    )(x, w_bf16, b.reshape(1, M))


def linear_ln(x, w_bf16, b, g, bb):
    N, K = x.shape
    M = w_bf16.shape[1]
    return pl.pallas_call(
        _linear_ln_kernel,
        out_shape=jax.ShapeDtypeStruct((N, M), jnp.float32),
        grid=(1,),
        in_specs=[pl.BlockSpec((N, K), lambda i: (0, 0)),
                  pl.BlockSpec((K, M), lambda i: (0, 0)),
                  pl.BlockSpec((1, M), lambda i: (0, 0)),
                  pl.BlockSpec((1, M), lambda i: (0, 0)),
                  pl.BlockSpec((1, M), lambda i: (0, 0))],
        out_specs=pl.BlockSpec((N, M), lambda i: (0, 0)),
        compiler_params=VMEM_SMALL,
    )(x, w_bf16, b.reshape(1, M), g.reshape(1, M), bb.reshape(1, M))


def layernorm(x, g, b):
    N, C = x.shape
    return pl.pallas_call(
        _layernorm_kernel,
        out_shape=jax.ShapeDtypeStruct((N, C), jnp.float32),
        grid=(1,),
        in_specs=[pl.BlockSpec((N, C), lambda i: (0, 0)),
                  pl.BlockSpec((1, C), lambda i: (0, 0)),
                  pl.BlockSpec((1, C), lambda i: (0, 0))],
        out_specs=pl.BlockSpec((N, C), lambda i: (0, 0)),
        compiler_params=VMEM_SMALL,
    )(x, g.reshape(1, C), b.reshape(1, C))


def pool_ln_head(x, g, b, hw, hb):
    # x: (B, HW, C) -> (B, 6): global average pool + LayerNorm + head Linear, fused.
    B, HW, C = x.shape
    M = hw.shape[1]
    pool = jnp.kron(jnp.eye(B, dtype=jnp.float32),
                    jnp.full((1, HW), 1.0 / HW, jnp.float32))        # (B, B*HW)
    xf = x.reshape(B * HW, C)
    return pl.pallas_call(
        _pool_ln_head_kernel,
        out_shape=jax.ShapeDtypeStruct((B, M), jnp.float32),
        grid=(1,),
        in_specs=[pl.BlockSpec((B * HW, C), lambda i: (0, 0)),
                  pl.BlockSpec((B, B * HW), lambda i: (0, 0)),
                  pl.BlockSpec((1, C), lambda i: (0, 0)),
                  pl.BlockSpec((1, C), lambda i: (0, 0)),
                  pl.BlockSpec((C, M), lambda i: (0, 0)),
                  pl.BlockSpec((1, M), lambda i: (0, 0))],
        out_specs=pl.BlockSpec((B, M), lambda i: (0, 0)),
        compiler_params=VMEM_SMALL,
    )(xf, pool, g.reshape(1, C), b.reshape(1, C), hw, hb.reshape(1, M))


def convnext_block(x, p):
    # x: (B, H, W, C) channels-last
    B, H, W, C = x.shape
    # TODO(synk): fill the 3-px halo in-kernel (VMEM scratch) to avoid this padded
    # HBM round-trip, and tile spatially (row bands) for further VMEM/2-TC scaling.
    xpad = jnp.pad(x, ((0, 0), (3, 3), (3, 3), (0, 0)))
    kern = functools.partial(_convnext_block_kernel, H=H, W=W, C=C)
    return pl.pallas_call(
        kern,
        out_shape=jax.ShapeDtypeStruct((B, H, W, C), jnp.float32),
        grid=(B,),
        in_specs=[
            pl.BlockSpec((1, H + 6, W + 6, C), lambda b: (b, 0, 0, 0)),
            pl.BlockSpec((49, C), lambda b: (0, 0)),
            pl.BlockSpec((1, C), lambda b: (0, 0)),
            pl.BlockSpec((1, C), lambda b: (0, 0)),
            pl.BlockSpec((1, C), lambda b: (0, 0)),
            pl.BlockSpec((C, 4 * C), lambda b: (0, 0)),      # bf16 weight
            pl.BlockSpec((1, 4 * C), lambda b: (0, 0)),
            pl.BlockSpec((4 * C, C), lambda b: (0, 0)),      # bf16 weight
            pl.BlockSpec((1, C), lambda b: (0, 0)),
            pl.BlockSpec((1, C), lambda b: (0, 0)),
        ],
        out_specs=pl.BlockSpec((1, H, W, C), lambda b: (b, 0, 0, 0)),
        # 48 MiB fits v7x's 64 MiB physical VMEM (and raises v5e's 16 MiB default);
        # bf16 MLP weights keep worst-case (stage-3) footprint ~24 MiB even with
        # default double-buffering.  TODO(synk): pad C to 128-multiples for stage 0/1.
        compiler_params=pltpu.CompilerParams(
            dimension_semantics=("parallel",),
            vmem_limit_bytes=48 * 1024 * 1024),
    )(xpad, p['dw_w'], p['dw_b'], p['ln_g'], p['ln_b'],
      p['w1'], p['b1'], p['w2'], p['b2'], p['ls'])


# ----------------------------------------------------------------------------
# Parameters (deterministic, synthetic)
# ----------------------------------------------------------------------------
def init_params(key, dims=DIMS, depths=DEPTHS):
    keys = iter(jax.random.split(key, 256))

    def dense(fan_in, shape, dtype=jnp.float32):
        w = jax.random.normal(next(keys), shape, jnp.float32) / jnp.sqrt(float(fan_in))
        return w.astype(dtype)

    params = {
        'stem': dict(
            w=dense(48, (48, dims[0]), jnp.bfloat16),
            b=jnp.zeros((dims[0],), jnp.float32),
            ln_g=jnp.ones((dims[0],), jnp.float32),
            ln_b=jnp.zeros((dims[0],), jnp.float32),
        ),
        'down': [],
        'stages': [],
    }
    for s in range(1, 4):
        cin, cout = dims[s - 1], dims[s]
        params['down'].append(dict(
            ln_g=jnp.ones((cin,), jnp.float32),
            ln_b=jnp.zeros((cin,), jnp.float32),
            w=dense(4 * cin, (4 * cin, cout), jnp.bfloat16),
            b=jnp.zeros((cout,), jnp.float32),
        ))
    for s in range(4):
        C = dims[s]
        blocks = []
        for _ in range(depths[s]):
            blocks.append(dict(
                dw_w=dense(49, (49, C)),                       # VPU path stays f32
                dw_b=jnp.zeros((1, C), jnp.float32),
                ln_g=jnp.ones((1, C), jnp.float32),
                ln_b=jnp.zeros((1, C), jnp.float32),
                w1=dense(C, (C, 4 * C), jnp.bfloat16),
                b1=jnp.zeros((1, 4 * C), jnp.float32),
                w2=dense(4 * C, (4 * C, C), jnp.bfloat16),
                b2=jnp.zeros((1, C), jnp.float32),
                ls=jnp.full((1, C), 1e-6, jnp.float32),        # layer-scale init
            ))
        params['stages'].append(blocks)
    params['norm_g'] = jnp.ones((dims[-1],), jnp.float32)
    params['norm_b'] = jnp.zeros((dims[-1],), jnp.float32)
    params['head_w'] = dense(dims[-1], (dims[-1], 6))          # tiny head stays f32
    params['head_b'] = jnp.zeros((6,), jnp.float32)
    return params


# ----------------------------------------------------------------------------
# Forward (mirrors PretrainedConvNext.forward)
# ----------------------------------------------------------------------------
def pretrained_convnext_forward(x, params, dims=DIMS):
    # x: (B, 3, H, W) NCHW float32
    B = x.shape[0]

    # F.interpolate(x, size=(224, 224), mode='bilinear', align_corners=True)
    x = bilinear_resize_224_nhwc(x)                  # (B, 224, 224, 3) NHWC

    # stem: 4x4 conv stride 4 as patchify + fused (matmul + LayerNorm)
    _, H, W, C = x.shape
    x = (x.reshape(B, H // 4, 4, W // 4, 4, C)
          .transpose(0, 1, 3, 2, 4, 5)
          .reshape(B * (H // 4) * (W // 4), 4 * 4 * C))
    x = linear_ln(x, params['stem']['w'], params['stem']['b'],
                  params['stem']['ln_g'], params['stem']['ln_b'])
    H, W, C = H // 4, W // 4, dims[0]
    x = x.reshape(B, H, W, C)

    for s in range(4):
        if s > 0:
            d = params['down'][s - 1]
            xf = layernorm(x.reshape(B * H * W, C), d['ln_g'], d['ln_b'])
            x = xf.reshape(B, H, W, C)
            # 2x2 stride-2 conv as patchify + matmul (bf16 MXU)
            x = (x.reshape(B, H // 2, 2, W // 2, 2, C)
                  .transpose(0, 1, 3, 2, 4, 5)
                  .reshape(B * (H // 2) * (W // 2), 4 * C))
            x = linear(x, d['w'], d['b'])
            H, W, C = H // 2, W // 2, dims[s]
            x = x.reshape(B, H, W, C)
        for blk in params['stages'][s]:
            x = convnext_block(x, blk)

    # timm backbone head (num_classes=0): global avg pool + LayerNorm, then the
    # external nn.Linear(768, 6) — all fused into one kernel.
    out = pool_ln_head(x.reshape(B, H * W, C),
                       params['norm_g'], params['norm_b'],
                       params['head_w'], params['head_b'])    # (B, 6)
    return out


if __name__ == "__main__":
    x = jax.random.normal(jax.random.PRNGKey(0), (2, 3, 32, 32), jnp.float32)
    params = init_params(jax.random.PRNGKey(42))
    out = pretrained_convnext_forward(x, params)
    out = jax.block_until_ready(out)
    assert out.shape == (2, 6) and out.dtype == jnp.float32
    print("KERNEL_OK")
</pallas_src>

<mosaic_0001>
module attributes {stable_mosaic.version = 11 : i64} {
  func.func @_matmul_kernel(%arg0: i32, %arg1: memref<192x32xf32, #tpu.memory_space<vmem>>, %arg2: memref<32x224xf32, #tpu.memory_space<vmem>>, %arg3: memref<192x224xf32, #tpu.memory_space<vmem>>) attributes {dimension_semantics = [#tpu.dimension_semantics<arbitrary>], iteration_bounds = array<i64: 1>, scalar_prefetch = 0 : i64, scratch_operands = 0 : i64, tpu.core_type = #tpu.core_type<tc>, window_params = [{pipeline_mode = #tpu.pipeline_mode<synchronous>, transform_indices = @transform_0, window_bounds = array<i64: 192, 32>}, {pipeline_mode = #tpu.pipeline_mode<synchronous>, transform_indices = @transform_1, window_bounds = array<i64: 32, 224>}, {pipeline_mode = #tpu.pipeline_mode<synchronous>, transform_indices = @transform_2, window_bounds = array<i64: 192, 224>}]} {
    %c0 = arith.constant 0 : index
    %c0_0 = arith.constant 0 : index
    %0 = vector.load %arg1[%c0, %c0_0] : memref<192x32xf32, #tpu.memory_space<vmem>>, vector<192x32xf32>
    %c0_1 = arith.constant 0 : index
    %c0_2 = arith.constant 0 : index
    %1 = vector.load %arg2[%c0_1, %c0_2] : memref<32x224xf32, #tpu.memory_space<vmem>>, vector<32x224xf32>
    %cst = arith.constant dense<0.000000e+00> : vector<192x224xf32>
    %2 = tpu.matmul %0, %1, %cst {dimension_numbers = #tpu.dot_dimension_numbers<[1], [0], [0], [1], [0, 0, 1, 1], [], []>} : vector<192x32xf32>, vector<32x224xf32>, vector<192x224xf32> -> vector<192x224xf32>
    %c0_3 = arith.constant 0 : index
    %c0_4 = arith.constant 0 : index
    %3 = vector.load %arg3[%c0_3, %c0_4] : memref<192x224xf32, #tpu.memory_space<vmem>>, vector<192x224xf32>
    tpu.vector_store %arg3[%c0_3, %c0_4], %2 {strides = array<i32>} : memref<192x224xf32, #tpu.memory_space<vmem>>, vector<192x224xf32>,
    return
  }
  func.func @transform_0(%arg0: i32) -> (i32, i32) {
    %c0_i32 = arith.constant 0 : i32
    %c0_i32_0 = arith.constant 0 : i32
    %c0_i32_1 = arith.constant 0 : i32
    return %c0_i32, %c0_i32_0 : i32, i32
  }
  func.func @transform_1(%arg0: i32) -> (i32, i32) {
    %c0_i32 = arith.constant 0 : i32
    %c0_i32_0 = arith.constant 0 : i32
    %c0_i32_1 = arith.constant 0 : i32
    return %c0_i32, %c0_i32_0 : i32, i32
  }
  func.func @transform_2(%arg0: i32) -> (i32, i32) {
    %c0_i32 = arith.constant 0 : i32
    %c0_i32_0 = arith.constant 0 : i32
    %c0_i32_1 = arith.constant 0 : i32
    return %c0_i32, %c0_i32_0 : i32, i32
  }
}

</mosaic_0001>

<bundles_post_ra>
// kernel: tpu_custom_call.1
= control target key start
LH: loop header
LB: loop body
LE: loop exit
PB: predicated region body
PF: predicated region fallthrough
CT: control target
= control target key end

     0   :  { %vm44_vm0 = vcmask 261120   ;;  %v449_v10 = vmov 0.0   ;;  %s639_s0 = inlined_call_operand.vmem [shape: f32[192,32], index: 0, kind: input, shape index: {}]   ;;  %s640_s1 = inlined_call_operand.vmem [shape: f32[32,224], index: 1, kind: input, shape index: {}]   ;;  %s641_s2 = inlined_call_operand.hbm [shape: f32[192,224], index: 2, kind: output, shape index: {}]  }
   0x1   :  { %v43_v0 = vld [vmem:[%s640_s1 + $0x38] sm:$0xff]  ;;  %v42_v1 = vld [vmem:[%s640_s1 + $0x30] sm:$0xff]  ;;  %v41_v2 = vld [vmem:[%s640_s1 + $0x28] sm:$0xff]  ;;  %181 = vmatprep.mubr.f32.mxu0 %v449_v10  ;;  %253 = vmatprep.mubr.f32.mxu1 %v449_v10 }
   0x2   :  { %141 = vmatprep.subr.mxu0 %v43_v0  ;;  %415 = vmatprep.subr.mxu1 %v43_v0  ;;  %v40_v3 = vld [vmem:[%s640_s1 + $0x20] sm:$0xff]  ;;  %v39_v4 = vld [vmem:[%s640_s1 + $0x18] sm:$0xff]  ;;  %v38_v5 = vld [vmem:[%s640_s1 + $0x10] sm:$0xff] }
   0x3   :  { %142 = vmatpush1.msra.mxu0 %v42_v1  ;;  %419 = vmatpush1.msra.mxu1 %v42_v1  ;;  %v37_v6 = vld [vmem:[%s640_s1 + $0x8] sm:$0xff]  ;;  %v36_v7 = vld [vmem:[%s640_s1] sm:$0xff] }
   0x4   :  { %143 = vmatprep.subr.mxu0 %v41_v2  ;;  %416 = vmatprep.subr.mxu1 %v41_v2  ;;  %v12_v8 = vld [vmem:[%s639_s0] sm:$0xff] }
   0x5   :  { %144 = vmatpush1.msra.mxu0 %v40_v3  ;;  %420 = vmatpush1.msra.mxu1 %v40_v3  ;;  %v24_v9 = vld [vmem:[%s639_s0 + $0x60] sm:$0xff] }
   0x6   :  { %145 = vmatprep.subr.mxu0 %v39_v4  ;;  %417 = vmatprep.subr.mxu1 %v39_v4 }
   0x7   :  { %146 = vmatpush1.msra.mxu0 %v38_v5  ;;  %421 = vmatpush1.msra.mxu1 %v38_v5 }
   0x8   :  { %147 = vmatprep.subr.mxu0 %v37_v6  ;;  %418 = vmatprep.subr.mxu1 %v37_v6 }
   0x9   :  { %148 = vmatpush1.msra.mxu0 %v36_v7  ;;  %422 = vmatpush1.msra.mxu1 %v36_v7 }
   0xa   :  { %391 = vmatmul.mubr.msk.f32.vlgmr.msra.gmra.mxu0 %vm44_vm0, %v12_v8  ;;  %403 = vmatmul.mubr.msk.f32.vlgmr.msra.gmra.mxu1 %vm44_vm0, %v24_v9 }
   0xb   :  { %7 = vsyncpa [#allocation3], 0  ;;  %187 = vmatprep.mubr.f32.mxu0 %v449_v10  ;;  %259 = vmatprep.mubr.f32.mxu1 %v449_v10  ;;  %v13_v11 = vld [vmem:[%s639_s0 + $0x8] sm:$0xff]  ;;  %v14_v13 = vld [vmem:[%s639_s0 + $0x10] sm:$0xff]  ;;  %vm327_vm1 = vcmask 785408  }
   0xc   :  { %v25_v12 = vld [vmem:[%s639_s0 + $0x68] sm:$0xff]  ;;  %v26_v14 = vld [vmem:[%s639_s0 + $0x70] sm:$0xff]  ;;  %v15_v15 = vld [vmem:[%s639_s0 + $0x18] sm:$0xff] }
   0xd   :  { %v27_v16 = vld [vmem:[%s639_s0 + $0x78] sm:$0xff]  ;;  %v16_v17 = vld [vmem:[%s639_s0 + $0x20] sm:$0xff]  ;;  %v17_v19 = vld [vmem:[%s639_s0 + $0x28] sm:$0xff] }
   0xe   :  { %392 = vmatmul.mubr.msk.f32.gmra.mxu0 %vm44_vm0, %v13_v11  ;;  %404 = vmatmul.mubr.msk.f32.gmra.mxu1 %vm44_vm0, %v25_v12  ;;  %v28_v18 = vld [vmem:[%s639_s0 + $0x80] sm:$0xff]  ;;  %v29_v20 = vld [vmem:[%s639_s0 + $0x88] sm:$0xff]  ;;  %v18_v21 = vld [vmem:[%s639_s0 + $0x30] sm:$0xff] }
   0xf   :  { %193 = vmatprep.mubr.f32.mxu0 %v449_v10  ;;  %265 = vmatprep.mubr.f32.mxu1 %v449_v10  ;;  %v30_v22 = vld [vmem:[%s639_s0 + $0x90] sm:$0xff]  ;;  %v19_v23 = vld [vmem:[%s639_s0 + $0x38] sm:$0xff]  ;;  %v20_v25 = vld [vmem:[%s639_s0 + $0x40] sm:$0xff] }
  0x10   :  { %v31_v24 = vld [vmem:[%s639_s0 + $0x98] sm:$0xff]  ;;  %v32_v26 = vld [vmem:[%s639_s0 + $0xa0] sm:$0xff]  ;;  %v21_v27 = vld [vmem:[%s639_s0 + $0x48] sm:$0xff] }
  0x11   :  { %v33_v28 = vld [vmem:[%s639_s0 + $0xa8] sm:$0xff]  ;;  %v22_v29 = vld [vmem:[%s639_s0 + $0x50] sm:$0xff]  ;;  %v23_v31 = vld [vmem:[%s639_s0 + $0x58] sm:$0xff] }
  0x12   :  { %393 = vmatmul.mubr.msk.f32.gmra.mxu0 %vm44_vm0, %v14_v13  ;;  %405 = vmatmul.mubr.msk.f32.gmra.mxu1 %vm44_vm0, %v26_v14  ;;  %v34_v30 = vld [vmem:[%s639_s0 + $0xb0] sm:$0xff]  ;;  %v35_v32 = vld [vmem:[%s639_s0 + $0xb8] sm:$0xff]  ;;  %s450_s0 = smov [#allocation2]  }
  0x13   :  { %199 = vmatprep.mubr.f32.mxu0 %v449_v10  ;;  %271 = vmatprep.mubr.f32.mxu1 %v449_v10  ;;  %s380_s15 = sshll.u32 %s450_s0, 4  ;;  %s381_s15 = int_to_ptr.vmem [resolvable:$true] %s380_s15 }
  0x14   :  { %s427_s16 = scalar_lea.vmem %s381_s15, 6144  ;;  %p432_p1 = scmp.lt.s32.totalorder %s381_s15, %s381_s15 }
  0x15   :  { %p428_p0 = scmp.ne.s32.totalorder %s381_s15, %s427_s16  ;;  %p433_p2 = scmp.lt.s32.totalorder %s427_s16, %s427_s16 }
  0x16   :  { %394 = vmatmul.mubr.msk.f32.gmra.mxu0 %vm44_vm0, %v15_v15  ;;  %406 = vmatmul.mubr.msk.f32.gmra.mxu1 %vm44_vm0, %v27_v16 }
  0x17   :  { %205 = vmatprep.mubr.f32.mxu0 %v449_v10  ;;  %277 = vmatprep.mubr.f32.mxu1 %v449_v10  ;;  %p434_p3 = por %p433_p2, %p432_p1 }
  0x19   :  { %p435_p4 = pnand %p434_p3, %p428_p0 }
  0x1a   :  { %395 = vmatmul.mubr.msk.f32.gmra.mxu0 %vm44_vm0, %v16_v17  ;;  %407 = vmatmul.mubr.msk.f32.gmra.mxu1 %vm44_vm0, %v28_v18 }
  0x1b   :  { %211 = vmatprep.mubr.f32.mxu0 %v449_v10  ;;  %283 = vmatprep.mubr.f32.mxu1 %v449_v10 }
  0x1e   :  { %396 = vmatmul.mubr.msk.f32.gmra.mxu0 %vm44_vm0, %v17_v19  ;;  %408 = vmatmul.mubr.msk.f32.gmra.mxu1 %vm44_vm0, %v29_v20 }
  0x1f   :  { %217 = vmatprep.mubr.f32.mxu0 %v449_v10  ;;  %289 = vmatprep.mubr.f32.mxu1 %v449_v10 }
  0x22   :  { %397 = vmatmul.mubr.msk.f32.gmra.mxu0 %vm44_vm0, %v18_v21  ;;  %409 = vmatmul.mubr.msk.f32.gmra.mxu1 %vm44_vm0, %v30_v22 }
  0x23   :  { %223 = vmatprep.mubr.f32.mxu0 %v449_v10  ;;  %295 = vmatprep.mubr.f32.mxu1 %v449_v10 }
  0x26   :  { %398 = vmatmul.mubr.msk.f32.gmra.mxu0 %vm44_vm0, %v19_v23  ;;  %410 = vmatmul.mubr.msk.f32.gmra.mxu1 %vm44_vm0, %v31_v24 }
  0x27   :  { %229 = vmatprep.mubr.f32.mxu0 %v449_v10  ;;  %301 = vmatprep.mubr.f32.mxu1 %v449_v10 }
  0x2a   :  { %399 = vmatmul.mubr.msk.f32.gmra.mxu0 %vm44_vm0, %v20_v25  ;;  %411 = vmatmul.mubr.msk.f32.gmra.mxu1 %vm44_vm0, %v32_v26 }
  0x2b   :  { %235 = vmatprep.mubr.f32.mxu0 %v449_v10  ;;  %307 = vmatprep.mubr.f32.mxu1 %v449_v10 }
  0x2e   :  { %400 = vmatmul.mubr.msk.f32.gmra.mxu0 %vm44_vm0, %v21_v27  ;;  %412 = vmatmul.mubr.msk.f32.gmra.mxu1 %vm44_vm0, %v33_v28 }
  0x2f   :  { %241 = vmatprep.mubr.f32.mxu0 %v449_v10  ;;  %313 = vmatprep.mubr.f32.mxu1 %v449_v10 }
  0x32   :  { %401 = vmatmul.mubr.msk.f32.gmra.mxu0 %vm44_vm0, %v22_v29  ;;  %413 = vmatmul.mubr.msk.f32.gmra.mxu1 %vm44_vm0, %v34_v30 }
  0x33   :  { %247 = vmatprep.mubr.f32.mxu0 %v449_v10  ;;  %319 = vmatprep.mubr.f32.mxu1 %v449_v10 }
  0x36   :  { %402 = vmatmul.mubr.msk.f32.gmra.mxu0 %vm44_vm0, %v23_v31  ;;  %414 = vmatmul.mubr.msk.f32.gmra.mxu1 %vm44_vm0, %v35_v32 }
  0xca   :  { %v183_v33 = vpop.f32.mrf.mxu0  ;;  %v255_v34 = vpop.f32.mrf.mxu1 }
  0xcb   :  { %326 = vst [vmem:[#allocation2] sm:$0xff] %v183_v33  ;;  %351 = vst [vmem:[#allocation2 + $0xc0] sm:$0xff] %v255_v34 }
  0xcc   :  { %v185_v35 = vpop.f32.mrf.mxu0  ;;  %v257_v36 = vpop.f32.mrf.mxu1 }
  0xcd   :  { %328 = vst.msk [vmem:[#allocation2 + $0x8] sm:$0xff] %vm327_vm1, %v185_v35  ;;  %352 = vst.msk [vmem:[#allocation2 + $0xc8] sm:$0xff] %vm327_vm1, %v257_v36 }
  0xce   :  { %v189_v37 = vpop.f32.mrf.mxu0  ;;  %v261_v38 = vpop.f32.mrf.mxu1 }
  0xcf   :  { %329 = vst [vmem:[#allocation2 + $0x10] sm:$0xff] %v189_v37  ;;  %353 = vst [vmem:[#allocation2 + $0xd0] sm:$0xff] %v261_v38 }
  0xd0   :  { %v191_v39 = vpop.f32.mrf.mxu0  ;;  %v263_v40 = vpop.f32.mrf.mxu1 }
  0xd1   :  { %330 = vst.msk [vmem:[#allocation2 + $0x18] sm:$0xff] %vm327_vm1, %v191_v39  ;;  %354 = vst.msk [vmem:[#allocation2 + $0xd8] sm:$0xff] %vm327_vm1, %v263_v40 }
  0xd2   :  { %v195_v41 = vpop.f32.mrf.mxu0  ;;  %v267_v42 = vpop.f32.mrf.mxu1 }
  0xd3   :  { %331 = vst [vmem:[#allocation2 + $0x20] sm:$0xff] %v195_v41  ;;  %355 = vst [vmem:[#allocation2 + $0xe0] sm:$0xff] %v267_v42 }
  0xd4   :  { %v197_v43 = vpop.f32.mrf.mxu0  ;;  %v269_v44 = vpop.f32.mrf.mxu1 }
  0xd5   :  { %332 = vst.msk [vmem:[#allocation2 + $0x28] sm:$0xff] %vm327_vm1, %v197_v43  ;;  %356 = vst.msk [vmem:[#allocation2 + $0xe8] sm:$0xff] %vm327_vm1, %v269_v44 }
  0xd6   :  { %v201_v45 = vpop.f32.mrf.mxu0  ;;  %v273_v46 = vpop.f32.mrf.mxu1 }
  0xd7   :  { %333 = vst [vmem:[#allocation2 + $0x30] sm:$0xff] %v201_v45  ;;  %357 = vst [vmem:[#allocation2 + $0xf0] sm:$0xff] %v273_v46 }
  0xd8   :  { %v203_v47 = vpop.f32.mrf.mxu0  ;;  %v275_v48 = vpop.f32.mrf.mxu1 }
  0xd9   :  { %334 = vst.msk [vmem:[#allocation2 + $0x38] sm:$0xff] %vm327_vm1, %v203_v47  ;;  %358 = vst.msk [vmem:[#allocation2 + $0xf8] sm:$0xff] %vm327_vm1, %v275_v48 }
  0xda   :  { %v207_v49 = vpop.f32.mrf.mxu0  ;;  %v279_v50 = vpop.f32.mrf.mxu1 }
  0xdb   :  { %335 = vst [vmem:[#allocation2 + $0x40] sm:$0xff] %v207_v49  ;;  %359 = vst [vmem:[#allocation2 + $0x100] sm:$0xff] %v279_v50 }
  0xdc   :  { %v209_v51 = vpop.f32.mrf.mxu0  ;;  %v281_v52 = vpop.f32.mrf.mxu1 }
  0xdd   :  { %336 = vst.msk [vmem:[#allocation2 + $0x48] sm:$0xff] %vm327_vm1, %v209_v51  ;;  %360 = vst.msk [vmem:[#allocation2 + $0x108] sm:$0xff] %vm327_vm1, %v281_v52 }
  0xde   :  { %v213_v53 = vpop.f32.mrf.mxu0  ;;  %v285_v54 = vpop.f32.mrf.mxu1 }
  0xdf   :  { %337 = vst [vmem:[#allocation2 + $0x50] sm:$0xff] %v213_v53  ;;  %361 = vst [vmem:[#allocation2 + $0x110] sm:$0xff] %v285_v54 }
  0xe0   :  { %v215_v55 = vpop.f32.mrf.mxu0  ;;  %v287_v56 = vpop.f32.mrf.mxu1 }
  0xe1   :  { %338 = vst.msk [vmem:[#allocation2 + $0x58] sm:$0xff] %vm327_vm1, %v215_v55  ;;  %362 = vst.msk [vmem:[#allocation2 + $0x118] sm:$0xff] %vm327_vm1, %v287_v56 }
  0xe2   :  { %v219_v57 = vpop.f32.mrf.mxu0  ;;  %v291_v58 = vpop.f32.mrf.mxu1 }
  0xe3   :  { %339 = vst [vmem:[#allocation2 + $0x60] sm:$0xff] %v219_v57  ;;  %363 = vst [vmem:[#allocation2 + $0x120] sm:$0xff] %v291_v58 }
  0xe4   :  { %v221_v59 = vpop.f32.mrf.mxu0  ;;  %v293_v60 = vpop.f32.mrf.mxu1 }
  0xe5   :  { %340 = vst.msk [vmem:[#allocation2 + $0x68] sm:$0xff] %vm327_vm1, %v221_v59  ;;  %364 = vst.msk [vmem:[#allocation2 + $0x128] sm:$0xff] %vm327_vm1, %v293_v60 }
  0xe6   :  { %v225_v61 = vpop.f32.mrf.mxu0  ;;  %v297_v62 = vpop.f32.mrf.mxu1 }
  0xe7   :  { %341 = vst [vmem:[#allocation2 + $0x70] sm:$0xff] %v225_v61  ;;  %365 = vst [vmem:[#allocation2 + $0x130] sm:$0xff] %v297_v62 }
  0xe8   :  { %v227_v63 = vpop.f32.mrf.mxu0  ;;  %v299_v0 = vpop.f32.mrf.mxu1 }
  0xe9   :  { %342 = vst.msk [vmem:[#allocation2 + $0x78] sm:$0xff] %vm327_vm1, %v227_v63  ;;  %366 = vst.msk [vmem:[#allocation2 + $0x138] sm:$0xff] %vm327_vm1, %v299_v0 }
  0xea   :  { %v231_v1 = vpop.f32.mrf.mxu0  ;;  %v303_v2 = vpop.f32.mrf.mxu1 }
  0xeb   :  { %343 = vst [vmem:[#allocation2 + $0x80] sm:$0xff] %v231_v1  ;;  %367 = vst [vmem:[#allocation2 + $0x140] sm:$0xff] %v303_v2 }
  0xec   :  { %v233_v3 = vpop.f32.mrf.mxu0  ;;  %v305_v4 = vpop.f32.mrf.mxu1 }
  0xed   :  { %344 = vst.msk [vmem:[#allocation2 + $0x88] sm:$0xff] %vm327_vm1, %v233_v3  ;;  %368 = vst.msk [vmem:[#allocation2 + $0x148] sm:$0xff] %vm327_vm1, %v305_v4 }
  0xee   :  { %v237_v5 = vpop.f32.mrf.mxu0  ;;  %v309_v6 = vpop.f32.mrf.mxu1 }
  0xef   :  { %345 = vst [vmem:[#allocation2 + $0x90] sm:$0xff] %v237_v5  ;;  %369 = vst [vmem:[#allocation2 + $0x150] sm:$0xff] %v309_v6 }
  0xf0   :  { %v239_v7 = vpop.f32.mrf.mxu0  ;;  %v311_v8 = vpop.f32.mrf.mxu1 }
  0xf1   :  { %346 = vst.msk [vmem:[#allocation2 + $0x98] sm:$0xff] %vm327_vm1, %v239_v7  ;;  %370 = vst.msk [vmem:[#allocation2 + $0x158] sm:$0xff] %vm327_vm1, %v311_v8 }
  0xf2   :  { %v243_v9 = vpop.f32.mrf.mxu0  ;;  %v315_v10 = vpop.f32.mrf.mxu1 }
  0xf3   :  { %347 = vst [vmem:[#allocation2 + $0xa0] sm:$0xff] %v243_v9  ;;  %371 = vst [vmem:[#allocation2 + $0x160] sm:$0xff] %v315_v10 }
  0xf4   :  { %v245_v11 = vpop.f32.mrf.mxu0  ;;  %v317_v12 = vpop.f32.mrf.mxu1 }
  0xf5   :  { %348 = vst.msk [vmem:[#allocation2 + $0xa8] sm:$0xff] %vm327_vm1, %v245_v11  ;;  %372 = vst.msk [vmem:[#allocation2 + $0x168] sm:$0xff] %vm327_vm1, %v317_v12 }
  0xf6   :  { %v249_v13 = vpop.f32.mrf.mxu0  ;;  %v321_v14 = vpop.f32.mrf.mxu1 }
  0xf7   :  { %349 = vst [vmem:[#allocation2 + $0xb0] sm:$0xff] %v249_v13  ;;  %373 = vst [vmem:[#allocation2 + $0x170] sm:$0xff] %v321_v14 }
  0xf8   :  { %v251_v15 = vpop.f32.mrf.mxu0  ;;  %v323_v16 = vpop.f32.mrf.mxu1 }
  0xf9   :  { %350 = vst.msk [vmem:[#allocation2 + $0xb8] sm:$0xff] %vm327_vm1, %v251_v15  ;;  %374 = vst.msk [vmem:[#allocation2 + $0x178] sm:$0xff] %vm327_vm1, %v323_v16 }
  0xfa   :  { %438 = shalt.err (!%p435_p4)
}
  0xfb   :  { %s451_s17 = smov 256   ;;  %s452_s18 = smov 16  }
  0xfc   :  { %386 = dma.vmem_to_hbm [thread:$0]  %s381_s15, 6144, %s641_s2, [#allocation3], %s451_s17, %s451_s17, %s452_s18  }
  0xfd   :  { %447 = dma.done.wait [#allocation3], 6144  }
  0xfe   :  { %448 = vsyncadd [#allocation3], 4294961152 }
  0xff   :  { %390 = vsyncpa [#allocation3], 1 }

</bundles_post_ra>
